<compile_context>
chip_gen: v5e
topology: v5e:2x2
jax: 0.10.0
libtpu: 0.0.40
codegen_flags: <defaults>
</compile_context>

<pallas_src>
import functools

import jax
import jax.numpy as jnp
from jax.experimental import pallas as pl
from jax.experimental.pallas import tpu as pltpu


def _magface_kernel(
    x_ref,        # (TB, F)   float32        embeddings (batch tile)
    side_ref,     # (TB, 2)   float32        [cos(margin), sin(margin)]
    labels_ref,   # (TB, 1)   int32          class labels (-1 == no margin)
    w_ref,        # (F, TC)   compute dtype  pre-normalized class weights, [K, N] layout
    ce_ref,       # (TB, 1)   float32        per-sample cross-entropy (output)
    xn_scr,       # (TB, F)   compute dtype  normalized x, resident across class tiles
    m_scr,        # (TB, 1)   float32        running max for logsumexp
    s_scr,        # (TB, 1)   float32        running sum for logsumexp
    tgt_scr,      # (TB, 1)   float32        target-class logit per sample
    *,
    scale,
    class_tile,
):
    j = pl.program_id(1)           # class-tile axis ("arbitrary", innermost)
    n_tiles = pl.num_programs(1)

    @pl.when(j == 0)
    def _init():
        x = x_ref[...].astype(jnp.float32)
        # F.normalize(x): x / max(||x||, 1e-12)  (rsqrt -> EUP, once per batch tile)
        inv_norm = jax.lax.rsqrt(
            jnp.maximum(jnp.sum(x * x, axis=-1, keepdims=True), 1e-24))
        xn_scr[...] = (x * inv_norm).astype(xn_scr.dtype)
        m_scr[...] = jnp.full_like(m_scr, -jnp.inf)
        s_scr[...] = jnp.zeros_like(s_scr)
        tgt_scr[...] = jnp.zeros_like(tgt_scr)

    # --- cos_theta tile on the MXU (bf16 operands, f32 accumulation), clamp ---
    cos = jnp.dot(xn_scr[...], w_ref[...], preferred_element_type=jnp.float32)
    cos = jnp.clip(cos, -1.0, 1.0)

    TB, TC = cos.shape
    labels = labels_ref[...]                                   # (TB, 1) int32
    col_ids = jax.lax.broadcasted_iota(jnp.int32, (TB, TC), 1) + j * class_tile
    is_target = (col_ids == labels) & (labels >= 0)            # (TB, TC) bool
    mask = is_target.astype(jnp.float32)

    # --- margin trig on the target column only ((TB, 1) vectors) ---
    side = side_ref[...].astype(jnp.float32)                   # (TB, 2)
    cos_m = side[:, 0:1]
    sin_m = side[:, 1:2]
    tgt_cos = jnp.sum(mask * cos, axis=-1, keepdims=True)      # (TB, 1)
    cnt = jnp.sum(mask, axis=-1, keepdims=True)                # (TB, 1) in {0, 1}
    sin_t = jnp.sqrt(jnp.maximum(1.0 - tgt_cos * tgt_cos, 0.0))
    tgt_logit = (tgt_cos * cos_m - sin_t * sin_m) * scale      # cos(acos(c)+m)*s, (TB,1)

    logits = jnp.where(is_target, tgt_logit, cos * scale)      # (TB, TC)

    # --- online logsumexp over class tiles + accumulate target logit ---
    m_prev = m_scr[...]
    m_new = jnp.maximum(m_prev, jnp.max(logits, axis=-1, keepdims=True))
    s_scr[...] = s_scr[...] * jnp.exp(m_prev - m_new) + jnp.sum(
        jnp.exp(logits - m_new), axis=-1, keepdims=True)
    m_scr[...] = m_new
    tgt_scr[...] = tgt_scr[...] + cnt * tgt_logit

    # --- finalize: per-sample cross entropy ---
    @pl.when(j == n_tiles - 1)
    def _final():
        lse = m_scr[...] + jnp.log(s_scr[...])
        ce_ref[...] = lse - tgt_scr[...]


def magface_loss(
    x,
    x_norm,
    labels,
    weight,
    *,
    u_margin,
    l_margin,
    u_a,
    l_a,
    lambda_g,
    scale=64.0,
    class_tile=1024,
    batch_tile=None,
    compute_dtype=jnp.bfloat16,
):
    """Pallas TPU implementation of ParallelMagFaceLossAlt.forward (returns scalar loss)."""
    B, F = x.shape
    C, F2 = weight.shape
    assert F == F2

    class_tile = min(class_tile, C)
    assert C % class_tile == 0, "classnum must be divisible by the class tile"
    assert class_tile == C or class_tile % 128 == 0, "class tile must be lane aligned"

    tile_b = B if batch_tile is None else batch_tile
    assert B % tile_b == 0
    assert tile_b == B or tile_b % 8 == 0, "batch tile must be sublane aligned"

    x = x.astype(jnp.float32)                                  # x = copy(x.float())
    x_norm1 = jnp.reshape(x_norm, (B,)).astype(jnp.float32)
    labels2 = jnp.reshape(labels, (B, 1)).astype(jnp.int32)

    # per-sample adaptive margin (O(B) glue); stream cos/sin of it as one block
    margin = (u_margin - l_margin) / (u_a - l_a) * (x_norm1 - l_a) + l_margin
    side = jnp.stack([jnp.cos(margin), jnp.sin(margin)], axis=-1).astype(jnp.float32)

    # Hoist the per-class weight normalization out of the kernel and present
    # the weight in [K, N] = (F, C) layout, streamed in bf16 (f32 accumulation).
    w32 = weight.astype(jnp.float32)
    wn = w32 / jnp.maximum(jnp.linalg.norm(w32, axis=-1, keepdims=True), 1e-12)
    w_t = wn.T.astype(compute_dtype)                           # (F, C)

    kernel = functools.partial(
        _magface_kernel, scale=float(scale), class_tile=class_tile)

    # VMEM budget: double-buffered weight tile dominates; keep under v7x's cap.
    itemsize = jnp.dtype(compute_dtype).itemsize
    lane_f = max(F, 128)
    est = (2 * class_tile * lane_f * itemsize        # weight tiles (double buffered)
           + 2 * tile_b * lane_f * 4                 # x block (double buffered)
           + tile_b * lane_f * itemsize              # xn scratch
           + 16 * tile_b * 128 * 4                   # small lane-padded blocks/scratch
           + (2 << 20))                              # slack
    assert est <= (48 << 20), "class_tile/batch_tile too large for the VMEM budget"
    vmem_limit = min(max(est, 32 << 20), 48 << 20)

    ce = pl.pallas_call(
        kernel,
        out_shape=jax.ShapeDtypeStruct((B, 1), jnp.float32),
        grid_spec=pltpu.PrefetchScalarGridSpec(
            num_scalar_prefetch=0,
            grid=(B // tile_b, C // class_tile),
            in_specs=[
                pl.BlockSpec((tile_b, F), lambda i, j: (i, 0)),          # x
                pl.BlockSpec((tile_b, 2), lambda i, j: (i, 0)),          # [cos m, sin m]
                pl.BlockSpec((tile_b, 1), lambda i, j: (i, 0)),          # labels
                pl.BlockSpec((F, class_tile), lambda i, j: (0, j)),      # normalized W^T tile
            ],
            out_specs=pl.BlockSpec((tile_b, 1), lambda i, j: (i, 0)),
            scratch_shapes=[
                pltpu.VMEM((tile_b, F), compute_dtype),   # normalized x
                pltpu.VMEM((tile_b, 1), jnp.float32),     # running max
                pltpu.VMEM((tile_b, 1), jnp.float32),     # running sum
                pltpu.VMEM((tile_b, 1), jnp.float32),     # target logit accum
            ],
        ),
        compiler_params=pltpu.CompilerParams(
            dimension_semantics=("parallel", "arbitrary"),
            vmem_limit_bytes=vmem_limit,
        ),
    )(x, side, labels2, w_t)

    # TODO(synk): rows with label == -1 skip the margin but still contribute
    # lse to the mean CE; parallel_cross_entropy's ignore-index behavior is not replicated.
    ce_mean = jnp.mean(ce[:, 0])
    # G-loss (O(B), done outside the kernel); no eps guard, matching the reference.
    g_loss = jnp.mean(x_norm1 / (u_a * u_a) + 1.0 / x_norm1)
    return ce_mean + lambda_g * g_loss


def _reference_loss(x, x_norm, labels, weight, *, u_margin, l_margin, u_a, l_a,
                    lambda_g, scale, matmul_dtype=jnp.float32):
    """Pure-JAX reference mirroring the PyTorch forward (acos / cos path).

    matmul_dtype lets the reference use the same operand precision (bf16) as
    the kernel's weight/activation stream, with f32 accumulation.
    """
    x = x.astype(jnp.float32)
    x_norm = jnp.reshape(x_norm, (-1,)).astype(jnp.float32)
    margin = (u_margin - l_margin) / (u_a - l_a) * (x_norm - l_a) + l_margin
    wn = weight.astype(jnp.float32)
    wn = wn / jnp.maximum(jnp.linalg.norm(wn, axis=-1, keepdims=True), 1e-12)
    xn = x / jnp.maximum(jnp.linalg.norm(x, axis=-1, keepdims=True), 1e-12)
    cos = jnp.dot(xn.astype(matmul_dtype), wn.T.astype(matmul_dtype),
                  preferred_element_type=jnp.float32)
    cos = jnp.clip(cos, -1.0, 1.0)
    theta = jnp.arccos(cos)
    valid = labels >= 0
    onehot = jax.nn.one_hot(jnp.where(valid, labels, 0), weight.shape[0],
                            dtype=jnp.float32)
    onehot = onehot * valid[:, None].astype(jnp.float32)
    theta = theta + onehot * margin[:, None]
    logits = jnp.cos(theta) * scale
    lse = jax.scipy.special.logsumexp(logits, axis=-1)
    tgt = jnp.sum(onehot * logits, axis=-1)
    ce = jnp.mean(lse - tgt)
    g = jnp.mean((1.0 / u_a ** 2) * x_norm + 1.0 / x_norm)
    return ce + lambda_g * g


if __name__ == "__main__":
    # Hyperparameters (typical MagFace settings), small demo shapes.
    NUM_FEATURES = 64
    CLASSNUM = 512
    U_MARGIN, L_MARGIN = 0.8, 0.45
    U_A, L_A = 110.0, 10.0
    LAMBDA_G = 35.0
    SCALE = 64.0
    BATCH = 8

    key = jax.random.PRNGKey(0)
    k_w, k_x, k_lbl = jax.random.split(key, 3)

    # Deterministic weight init mimicking uniform_(-1,1).renorm_(2,1,1e-5).mul_(1e5):
    # each column (over classnum) ends up with unit L2 norm.
    w = jax.random.uniform(k_w, (CLASSNUM, NUM_FEATURES),
                           minval=-1.0, maxval=1.0, dtype=jnp.float32)
    w = w / jnp.linalg.norm(w, axis=0, keepdims=True)

    # Embeddings, their norms, and labels.
    x = 10.0 * jax.random.normal(k_x, (BATCH, NUM_FEATURES), dtype=jnp.float32)
    x_norm = jnp.linalg.norm(x, axis=-1)                      # (B,)
    labels = jax.random.randint(k_lbl, (BATCH,), 0, CLASSNUM, dtype=jnp.int32)

    loss = magface_loss(
        x, x_norm, labels, w,
        u_margin=U_MARGIN, l_margin=L_MARGIN,
        u_a=U_A, l_a=L_A, lambda_g=LAMBDA_G, scale=SCALE,
        class_tile=256,                      # 2 class tiles -> exercises online logsumexp
        compute_dtype=jnp.bfloat16,          # bf16 weight/activation stream, f32 accumulate
    )
    loss = jax.block_until_ready(loss)

    # Reference with the same (bf16 operand, f32 accumulate) matmul precision.
    ref = _reference_loss(
        x, x_norm, labels, w,
        u_margin=U_MARGIN, l_margin=L_MARGIN,
        u_a=U_A, l_a=L_A, lambda_g=LAMBDA_G, scale=SCALE,
        matmul_dtype=jnp.bfloat16,
    )
    ref = jax.block_until_ready(ref)

    assert jnp.isfinite(loss), f"non-finite loss: {loss}"
    assert jnp.allclose(loss, ref, rtol=5e-3, atol=5e-3), (float(loss), float(ref))
    print("KERNEL_OK")
</pallas_src>

<mosaic_0001>
module attributes {stable_mosaic.version = 11 : i64} {
  func.func @_magface_kernel(%arg0: i32, %arg1: i32, %arg2: memref<8x64xf32, #tpu.memory_space<vmem>>, %arg3: memref<8x2xf32, #tpu.memory_space<vmem>>, %arg4: memref<8x1xi32, #tpu.memory_space<vmem>>, %arg5: memref<64x256xbf16, #tpu.memory_space<vmem>>, %arg6: memref<8x1xf32, #tpu.memory_space<vmem>>, %arg7: memref<8x64xbf16, #tpu.memory_space<vmem>>, %arg8: memref<8x1xf32, #tpu.memory_space<vmem>>, %arg9: memref<8x1xf32, #tpu.memory_space<vmem>>, %arg10: memref<8x1xf32, #tpu.memory_space<vmem>>) attributes {dimension_semantics = [#tpu.dimension_semantics<parallel>, #tpu.dimension_semantics<arbitrary>], iteration_bounds = array<i64: 1, 2>, scalar_prefetch = 0 : i64, scratch_operands = 4 : i64, tpu.core_type = #tpu.core_type<tc>, window_params = [{transform_indices = @transform_0, window_bounds = array<i64: 8, 64>}, {transform_indices = @transform_1, window_bounds = array<i64: 8, 2>}, {transform_indices = @transform_2, window_bounds = array<i64: 8, 1>}, {transform_indices = @transform_3, window_bounds = array<i64: 64, 256>}, {transform_indices = @transform_4, window_bounds = array<i64: 8, 1>}]} {
    %c0_i32 = arith.constant 0 : i32
    %0 = arith.cmpi eq, %arg1, %c0_i32 : i32
    %1 = arith.extui %0 : i1 to i32
    %c0_i32_0 = arith.constant 0 : i32
    %2 = arith.cmpi ne, %1, %c0_i32_0 : i32
    scf.if %2 {
      %c0_32 = arith.constant 0 : index
      %c0_33 = arith.constant 0 : index
      %70 = vector.load %arg2[%c0_32, %c0_33] : memref<8x64xf32, #tpu.memory_space<vmem>>, vector<8x64xf32>
      %71 = arith.mulf %70, %70 : vector<8x64xf32>
      %cst_34 = arith.constant dense<0.000000e+00> : vector<8xf32>
      %72 = vector.multi_reduction <add>, %71, %cst_34 [1] : vector<8x64xf32> to vector<8xf32>
      %73 = vector.shape_cast %72 : vector<8xf32> to vector<8x1xf32>
      %cst_35 = arith.constant 1.000000e-24 : f32
      %74 = vector.broadcast %cst_35 : f32 to vector<8x1xf32>
      %75 = arith.maximumf %73, %74 : vector<8x1xf32>
      %76 = math.rsqrt %75 : vector<8x1xf32>
      %77 = vector.broadcast %76 : vector<8x1xf32> to vector<8x64xf32>
      %78 = arith.mulf %70, %77 : vector<8x64xf32>
      %79 = arith.truncf %78 : vector<8x64xf32> to vector<8x64xbf16>
      %c0_36 = arith.constant 0 : index
      %c0_37 = arith.constant 0 : index
      %80 = vector.load %arg7[%c0_36, %c0_37] : memref<8x64xbf16, #tpu.memory_space<vmem>>, vector<8x64xbf16>
      tpu.vector_store %arg7[%c0_36, %c0_37], %79 {strides = array<i32>} : memref<8x64xbf16, #tpu.memory_space<vmem>>, vector<8x64xbf16>,
      %cst_38 = arith.constant 0xFF800000 : f32
      %81 = vector.broadcast %cst_38 : f32 to vector<8x1xf32>
      %c0_39 = arith.constant 0 : index
      %c0_40 = arith.constant 0 : index
      %82 = vector.load %arg8[%c0_39, %c0_40] : memref<8x1xf32, #tpu.memory_space<vmem>>, vector<8x1xf32>
      tpu.vector_store %arg8[%c0_39, %c0_40], %81 {strides = array<i32>} : memref<8x1xf32, #tpu.memory_space<vmem>>, vector<8x1xf32>,
      %cst_41 = arith.constant 0.000000e+00 : f32
      %83 = vector.broadcast %cst_41 : f32 to vector<8x1xf32>
      %c0_42 = arith.constant 0 : index
      %c0_43 = arith.constant 0 : index
      %84 = vector.load %arg9[%c0_42, %c0_43] : memref<8x1xf32, #tpu.memory_space<vmem>>, vector<8x1xf32>
      tpu.vector_store %arg9[%c0_42, %c0_43], %83 {strides = array<i32>} : memref<8x1xf32, #tpu.memory_space<vmem>>, vector<8x1xf32>,
      %cst_44 = arith.constant 0.000000e+00 : f32
      %85 = vector.broadcast %cst_44 : f32 to vector<8x1xf32>
      %c0_45 = arith.constant 0 : index
      %c0_46 = arith.constant 0 : index
      %86 = vector.load %arg10[%c0_45, %c0_46] : memref<8x1xf32, #tpu.memory_space<vmem>>, vector<8x1xf32>
      tpu.vector_store %arg10[%c0_45, %c0_46], %85 {strides = array<i32>} : memref<8x1xf32, #tpu.memory_space<vmem>>, vector<8x1xf32>,
    } else {
    }
    %c0 = arith.constant 0 : index
    %c0_1 = arith.constant 0 : index
    %3 = vector.load %arg7[%c0, %c0_1] : memref<8x64xbf16, #tpu.memory_space<vmem>>, vector<8x64xbf16>
    %c0_2 = arith.constant 0 : index
    %c0_3 = arith.constant 0 : index
    %4 = vector.load %arg5[%c0_2, %c0_3] : memref<64x256xbf16, #tpu.memory_space<vmem>>, vector<64x256xbf16>
    %cst = arith.constant dense<0.000000e+00> : vector<8x256xf32>
    %5 = tpu.matmul %3, %4, %cst {dimension_numbers = #tpu.dot_dimension_numbers<[1], [0], [0], [1], [0, 0, 1, 1], [], []>} : vector<8x64xbf16>, vector<64x256xbf16>, vector<8x256xf32> -> vector<8x256xf32>
    %cst_4 = arith.constant -1.000000e+00 : f32
    %cst_5 = arith.constant 1.000000e+00 : f32
    %6 = vector.broadcast %cst_4 : f32 to vector<8x256xf32>
    %7 = arith.maximumf %6, %5 : vector<8x256xf32>
    %8 = vector.broadcast %cst_5 : f32 to vector<8x256xf32>
    %9 = arith.minimumf %8, %7 : vector<8x256xf32>
    %c0_6 = arith.constant 0 : index
    %c0_7 = arith.constant 0 : index
    %10 = vector.load %arg4[%c0_6, %c0_7] : memref<8x1xi32, #tpu.memory_space<vmem>>, vector<8x1xi32>
    %11 = tpu.iota {dimensions = array<i32: 1>} : vector<8x256xi32>
    %c256_i32 = arith.constant 256 : i32
    %12 = arith.muli %arg1, %c256_i32 : i32
    %13 = vector.broadcast %12 : i32 to vector<8x256xi32>
    %14 = arith.addi %11, %13 : vector<8x256xi32>
    %15 = vector.broadcast %10 : vector<8x1xi32> to vector<8x256xi32>
    %16 = arith.cmpi eq, %14, %15 : vector<8x256xi32>
    %c0_i32_8 = arith.constant 0 : i32
    %17 = vector.broadcast %c0_i32_8 : i32 to vector<8x1xi32>
    %18 = arith.cmpi sge, %10, %17 : vector<8x1xi32>
    %19 = vector.broadcast %18 : vector<8x1xi1> to vector<8x256xi1>
    %20 = arith.andi %16, %19 : vector<8x256xi1>
    %21 = arith.extui %20 : vector<8x256xi1> to vector<8x256xi32>
    %22 = arith.sitofp %21 : vector<8x256xi32> to vector<8x256xf32>
    %c0_9 = arith.constant 0 : index
    %c0_10 = arith.constant 0 : index
    %23 = vector.load %arg3[%c0_9, %c0_10] : memref<8x2xf32, #tpu.memory_space<vmem>>, vector<8x2xf32>
    %24 = vector.extract_strided_slice %23 {offsets = [0, 0], sizes = [8, 1], strides = [1, 1]} : vector<8x2xf32> to vector<8x1xf32>
    %25 = vector.extract_strided_slice %23 {offsets = [0, 1], sizes = [8, 1], strides = [1, 1]} : vector<8x2xf32> to vector<8x1xf32>
    %26 = arith.mulf %22, %9 : vector<8x256xf32>
    %cst_11 = arith.constant dense<0.000000e+00> : vector<8xf32>
    %27 = vector.multi_reduction <add>, %26, %cst_11 [1] : vector<8x256xf32> to vector<8xf32>
    %28 = vector.shape_cast %27 : vector<8xf32> to vector<8x1xf32>
    %cst_12 = arith.constant dense<0.000000e+00> : vector<8xf32>
    %29 = vector.multi_reduction <add>, %22, %cst_12 [1] : vector<8x256xf32> to vector<8xf32>
    %30 = vector.shape_cast %29 : vector<8xf32> to vector<8x1xf32>
    %31 = arith.mulf %28, %28 : vector<8x1xf32>
    %cst_13 = arith.constant 1.000000e+00 : f32
    %32 = vector.broadcast %cst_13 : f32 to vector<8x1xf32>
    %33 = arith.subf %32, %31 : vector<8x1xf32>
    %cst_14 = arith.constant 0.000000e+00 : f32
    %34 = vector.broadcast %cst_14 : f32 to vector<8x1xf32>
    %35 = arith.maximumf %33, %34 : vector<8x1xf32>
    %36 = math.sqrt %35 : vector<8x1xf32>
    %37 = arith.mulf %28, %24 : vector<8x1xf32>
    %38 = arith.mulf %36, %25 : vector<8x1xf32>
    %39 = arith.subf %37, %38 : vector<8x1xf32>
    %cst_15 = arith.constant 6.400000e+01 : f32
    %40 = vector.broadcast %cst_15 : f32 to vector<8x1xf32>
    %41 = arith.mulf %39, %40 : vector<8x1xf32>
    %cst_16 = arith.constant 6.400000e+01 : f32
    %42 = vector.broadcast %cst_16 : f32 to vector<8x256xf32>
    %43 = arith.mulf %9, %42 : vector<8x256xf32>
    %44 = vector.shape_cast %41 : vector<8x1xf32> to vector<8x1xf32>
    %45 = vector.broadcast %44 : vector<8x1xf32> to vector<8x256xf32>
    %46 = arith.select %20, %45, %43 : vector<8x256xi1>, vector<8x256xf32>
    %c0_17 = arith.constant 0 : index
    %c0_18 = arith.constant 0 : index
    %47 = vector.load %arg8[%c0_17, %c0_18] : memref<8x1xf32, #tpu.memory_space<vmem>>, vector<8x1xf32>
    %cst_19 = arith.constant dense<0xFF800000> : vector<8xf32>
    %48 = vector.multi_reduction <maximumf>, %46, %cst_19 [1] : vector<8x256xf32> to vector<8xf32>
    %49 = vector.shape_cast %48 : vector<8xf32> to vector<8x1xf32>
    %50 = arith.maximumf %47, %49 : vector<8x1xf32>
    %c0_20 = arith.constant 0 : index
    %c0_21 = arith.constant 0 : index
    %51 = vector.load %arg9[%c0_20, %c0_21] : memref<8x1xf32, #tpu.memory_space<vmem>>, vector<8x1xf32>
    %52 = arith.subf %47, %50 : vector<8x1xf32>
    %53 = math.exp %52 : vector<8x1xf32>
    %54 = arith.mulf %51, %53 : vector<8x1xf32>
    %55 = vector.broadcast %50 : vector<8x1xf32> to vector<8x256xf32>
    %56 = arith.subf %46, %55 : vector<8x256xf32>
    %57 = math.exp %56 : vector<8x256xf32>
    %cst_22 = arith.constant dense<0.000000e+00> : vector<8xf32>
    %58 = vector.multi_reduction <add>, %57, %cst_22 [1] : vector<8x256xf32> to vector<8xf32>
    %59 = vector.shape_cast %58 : vector<8xf32> to vector<8x1xf32>
    %60 = arith.addf %54, %59 : vector<8x1xf32>
    %c0_23 = arith.constant 0 : index
    %c0_24 = arith.constant 0 : index
    %61 = vector.load %arg9[%c0_23, %c0_24] : memref<8x1xf32, #tpu.memory_space<vmem>>, vector<8x1xf32>
    tpu.vector_store %arg9[%c0_23, %c0_24], %60 {strides = array<i32>} : memref<8x1xf32, #tpu.memory_space<vmem>>, vector<8x1xf32>,
    %c0_25 = arith.constant 0 : index
    %c0_26 = arith.constant 0 : index
    %62 = vector.load %arg8[%c0_25, %c0_26] : memref<8x1xf32, #tpu.memory_space<vmem>>, vector<8x1xf32>
    tpu.vector_store %arg8[%c0_25, %c0_26], %50 {strides = array<i32>} : memref<8x1xf32, #tpu.memory_space<vmem>>, vector<8x1xf32>,
    %c0_27 = arith.constant 0 : index
    %c0_28 = arith.constant 0 : index
    %63 = vector.load %arg10[%c0_27, %c0_28] : memref<8x1xf32, #tpu.memory_space<vmem>>, vector<8x1xf32>
    %64 = arith.mulf %30, %41 : vector<8x1xf32>
    %65 = arith.addf %63, %64 : vector<8x1xf32>
    %c0_29 = arith.constant 0 : index
    %c0_30 = arith.constant 0 : index
    %66 = vector.load %arg10[%c0_29, %c0_30] : memref<8x1xf32, #tpu.memory_space<vmem>>, vector<8x1xf32>
    tpu.vector_store %arg10[%c0_29, %c0_30], %65 {strides = array<i32>} : memref<8x1xf32, #tpu.memory_space<vmem>>, vector<8x1xf32>,
    %c1_i32 = arith.constant 1 : i32
    %67 = arith.cmpi eq, %arg1, %c1_i32 : i32
    %68 = arith.extui %67 : i1 to i32
    %c0_i32_31 = arith.constant 0 : i32
    %69 = arith.cmpi ne, %68, %c0_i32_31 : i32
    scf.if %69 {
      %c0_32 = arith.constant 0 : index
      %c0_33 = arith.constant 0 : index
      %70 = vector.load %arg8[%c0_32, %c0_33] : memref<8x1xf32, #tpu.memory_space<vmem>>, vector<8x1xf32>
      %c0_34 = arith.constant 0 : index
      %c0_35 = arith.constant 0 : index
      %71 = vector.load %arg9[%c0_34, %c0_35] : memref<8x1xf32, #tpu.memory_space<vmem>>, vector<8x1xf32>
      %72 = math.log %71 : vector<8x1xf32>
      %73 = arith.addf %70, %72 : vector<8x1xf32>
      %c0_36 = arith.constant 0 : index
      %c0_37 = arith.constant 0 : index
      %74 = vector.load %arg10[%c0_36, %c0_37] : memref<8x1xf32, #tpu.memory_space<vmem>>, vector<8x1xf32>
      %75 = arith.subf %73, %74 : vector<8x1xf32>
      %c0_38 = arith.constant 0 : index
      %c0_39 = arith.constant 0 : index
      %76 = vector.load %arg6[%c0_38, %c0_39] : memref<8x1xf32, #tpu.memory_space<vmem>>, vector<8x1xf32>
      tpu.vector_store %arg6[%c0_38, %c0_39], %75 {strides = array<i32>} : memref<8x1xf32, #tpu.memory_space<vmem>>, vector<8x1xf32>,
    } else {
    }
    return
  }
  func.func @transform_0(%arg0: i32, %arg1: i32) -> (i32, i32) {
    %c0_i32 = arith.constant 0 : i32
    %c0_i32_0 = arith.constant 0 : i32
    return %arg0, %c0_i32 : i32, i32
  }
  func.func @transform_1(%arg0: i32, %arg1: i32) -> (i32, i32) {
    %c0_i32 = arith.constant 0 : i32
    %c0_i32_0 = arith.constant 0 : i32
    return %arg0, %c0_i32 : i32, i32
  }
  func.func @transform_2(%arg0: i32, %arg1: i32) -> (i32, i32) {
    %c0_i32 = arith.constant 0 : i32
    %c0_i32_0 = arith.constant 0 : i32
    return %arg0, %c0_i32 : i32, i32
  }
  func.func @transform_3(%arg0: i32, %arg1: i32) -> (i32, i32) {
    %c0_i32 = arith.constant 0 : i32
    %c0_i32_0 = arith.constant 0 : i32
    return %c0_i32, %arg1 : i32, i32
  }
  func.func @transform_4(%arg0: i32, %arg1: i32) -> (i32, i32) {
    %c0_i32 = arith.constant 0 : i32
    %c0_i32_0 = arith.constant 0 : i32
    return %arg0, %c0_i32 : i32, i32
  }
}

</mosaic_0001>

<bundles_post_ra>
// kernel: tpu_custom_call.1
= control target key start
LH: loop header
LB: loop body
LE: loop exit
PB: predicated region body
PF: predicated region fallthrough
CT: control target
= control target key end

     0   :  { %9 = vsyncpa [#allocation7], 0  ;;  %s1012_s0 = inlined_call_operand.vmem [shape: f32[8,64], index: 0, kind: input, shape index: {}]   ;;  %s1013_s1 = inlined_call_operand.vmem [shape: f32[8,2], index: 1, kind: input, shape index: {}]   ;;  %s1014_s2 = inlined_call_operand.vmem [shape: s32[8,1], index: 2, kind: input, shape index: {}]   ;;  %s1015_s3 = inlined_call_operand.hbm [shape: bf16[64,512], index: 3, kind: input, shape index: {}]   ;;  %s1016_s4 = inlined_call_operand.vmem [shape: f32[8,1], index: 4, kind: output, shape index: {}]  }
   0x1   :  { %11 = vsyncpa [#allocation7 + $0x1], 0  ;;  %s876_s15 = smov 0   ;;  %s878_s16 = smov 0  }
   0x2   :  { %s880_s17 = smov 0   ;;  %s882_s18 = smov 0  }
   0x3   :  { %s884_s19 = smov 0   ;;  %s886_s20 = smov 0  }
   0x4 LB: > { %s620_s21 = sadd.s32 4294967295, %s841_s20   ;;  %s26_s22 = sadd.s32 1, %s837_s19  ;;  %s841_s20 = sphi %s886_s20, %s17_s20   ;;  %s837_s19 = sphi %s884_s19, %s1027_s19   ;;  %s833_s18 = sphi %s882_s18, %s1026_s18   ;;  %s829_s17 = sphi %s880_s17, %s1025_s17   ;;  %s825_s16 = sphi %s878_s16, %s1024_s16   ;;  %s821_s15 = sphi %s876_s15, %s1023_s15  }
   0x5   : > { %p27_p0 = scmp.ge.s32.totalorder %s26_s22, 2  ;;  %s114_s23 = sadd.s32 1, %s829_s17 }
   0x6   : > { %p121_p1 = scmp.ne.s32.totalorder %s829_s17, %s825_s16  ;;  %p122_p2 = scmp.eq.s32.totalorder %s841_s20, 0 }
   0x7   : > { %s1029_s22 = smov (%p27_p0, %s26_s22), 0  ;;  %p127_p4 = scmp.ne.s32.totalorder %s825_s16, %s821_s15 }
   0x8   : > { %p912_p3 = por %p122_p2, %p121_p1  ;;  %s111_s25 = ssub.s32 %s837_s19, %s1029_s22 }
   0x9   : > { %p128_p5 = scmp.eq.s32.totalorder %s620_s21, 0  ;;  %p112_p6 = scmp.eq.s32.totalorder %s111_s25, 0 }
   0xa   : > { %p690_p8 = scmp.lt.s32.totalorder %s841_s20, 2  ;;  %s198_s28 = sand.u32 1, %s829_s17  }
   0xb   : > { %p919_p7 = por %p128_p5, %p127_p4  ;;  %s675_s29 = sshll.u32 %s837_s19, 3 }
   0xc   : > { %s925_s27 = scalar_select %p112_p6, %s829_s17, %s114_s23  }
   0xd   : > { %s626_s30 = sshll.u32 %s198_s28, 6  ;;  %s207_s7 = scalar_lea.hbm %s1015_s3, %s675_s29 }
   0xe   : > { %s208_s8 = sshll.u32 %s207_s7, 4  ;;  %s202_s9 = scalar_lea.vmem [#allocation6], %s626_s30  ;;  %s209_s8 = int_to_ptr.hbm [resolvable:$true] %s208_s8 }
   0xf   : > { %s210_s10 = sshll.u32 %s202_s9, 4  ;;  %p687_p9 = pnand %p690_p8, %p912_p3  ;;  %s211_s10 = int_to_ptr.vmem [resolvable:$true] %s210_s10 }
  0x10   : > { %p629_p10 = scmp.ge.s32.totalorder %s841_s20, 1  ;;  %s199_s11 = scalar_lea.sflag [#allocation7], %s198_s28 }
  0x11   : > { %s843_s12 = smov 256   ;;  %s844_s13 = smov 128  }
  0x12   : > { %s845_s14 = smov 8   ;;  %p218_p11 = scmp.lt.s32.totalorder %s841_s20, 3 }
  0x13   : > { %689 = dma.hbm_to_vmem [thread:$0]  (!%p687_p9), %s209_s8, 1024, %s211_s10, %s199_s11, %s843_s12, %s844_s13, %s845_s14  }
  0x14   : > { %p219_p12 = pnand %p629_p10, %p218_p11 }
  0x15   : > { %s224_s15 = sand.u32 (!%p219_p12), 1, %s825_s16  }
  0x16   : > { %222 = sbr.rel (%p219_p12) target bundleno = 1076 (0x434), region = 36  ;;  %s630_s21 = sshll.u32 (!%p219_p12), %s224_s15, 6 }
  0x17   : > { %s225_s23 = scalar_lea.sflag (!%p219_p12), [#allocation7], %s224_s15  ;;  %s937_s25 = scalar_lea.vmem (!%p219_p12), [#allocation6], %s630_s21 }
  0x1b   : > { %816 = dma.done.wait (%p919_p7), %s225_s23, 1024  }
  0x1c   : > { %818 = vsyncadd (%p919_p7), %s225_s23, 4294966272  ;;  %p631_p13 = scmp.ne.s32.totalorder %s833_s18, 0 }
  0x1e   : > { %286 = sbr.rel (%p631_p13) target bundleno = 180 (0xb4), region = 44 }
  0x23   : > { %v287_v0 = vld [vmem:[%s1012_s0] sm:$0xff]  ;;  %vm289_vm0 = vcmask 523264   ;;  %vm308_vm1 = vcmask 7168   ;;  %v846_v3 = vmov -inf   ;;  %v847_v4 = vmov 0.0  }
  0x24   : > { %v288_v1 = vmul.f32 %v287_v0, %v287_v0  ;;  %309 = vst.msk [vmem:[#allocation3] sm:$0xff] %vm308_vm1, %v846_v3  ;;  %vm306_vm5 = vcmask 519168  }
  0x25   : > { %310 = vst.msk [vmem:[#allocation4] sm:$0xff] %vm308_vm1, %v847_v4 }
  0x26   : > { %v290_v2 = vsel %vm289_vm0, %v288_v1, 0.0  ;;  %311 = vst.msk [vmem:[#allocation5] sm:$0xff] %vm308_vm1, %v847_v4 }
  0x27   : > { %291 = vadd.xlane.f32.xlu0 %v290_v2 }
  0x9a   : > { %v292_v5 = vpop.xlane.xlu0 %291 }
  0x9b   : > { %v293_v6 = vmax.f32 %v292_v5, 1e-24 }
  0x9d   : > { %747 = vrsqrt.f32 %v293_v6  ;;  %vm300_vm3 = vweird.f32 %v293_v6 }
  0xa3   : > { %v748_v7 = vpop.eup %747 }
  0xa4   : > { %v295_v8 = vmul.f32 %v748_v7, %v293_v6  ;;  %vm301_vm2 = vweird.f32 %v748_v7 }
  0xa5   : > { %vm302_vm4 = vmor %vm300_vm3, %vm301_vm2 }
  0xa6   : > { %v296_v9 = vmul.f32 %v748_v7, %v295_v8 }
  0xa8   : > { %v297_v10 = vmul.f32 0.5, %v296_v9 }
  0xaa   : > { %v298_v11 = vsub.f32 1.5, %v297_v10 }
  0xac   : > { %v299_v12 = vmul.f32 %v748_v7, %v298_v11 }
  0xae   : > { %v303_v13 = vsel %vm302_vm4, %v748_v7, %v299_v12 }
  0xaf   : > { %v304_v14 = vmul.f32 %v303_v13, %v287_v0 }
  0xb1   : > { %v305_v15 = vpack.c.bf16 %v304_v14, %v304_v14 }
  0xb3   : > { %307 = vst.msk [vmem:[#allocation2] sm:$0xf] %vm306_vm5, %v305_v15 }
  0xb4 PF: > { %v658_v16 = vld [vmem:[%s937_s25 + $0x30] sm:$0xf]  ;;  %v683_v17 = vld [vmem:[%s937_s25 + $0x34] sm:$0xf0]  ;;  %v682_v18 = vld [vmem:[%s937_s25 + $0x34] sm:$0xf]  ;;  %v396_v44 = vlaneseq }
  0xb5   : > { %v659_v19 = vor.u32 %v683_v17, %v658_v16  ;;  %v660_v20 = vld [vmem:[%s937_s25 + $0x38] sm:$0xf0]  ;;  %v650_v21 = vld [vmem:[%s937_s25 + $0x20] sm:$0xf]  ;;  %v681_v22 = vld [vmem:[%s937_s25 + $0x24] sm:$0xf0] }
  0xb6   : > { %v663_v23 = vor.u32 %v682_v18, %v660_v20  ;;  %v680_v24 = vld [vmem:[%s937_s25 + $0x24] sm:$0xf]  ;;  %v652_v25 = vld [vmem:[%s937_s25 + $0x28] sm:$0xf0]  ;;  %v651_v27 = vor.u32 %v681_v22, %v650_v21  ;;  %v848_v28 = vmov 0   ;;  %vm361_vm7 = vcmask 523264  }
  0xb7   : > { %v395_v26 = vld [vmem:[%s1014_s2] sm:$0xff]  ;;  %369 = vmatpush.bf16.msra.mxu0 %v659_v19  ;;  %749 = vset.pattern.permute.xlu0 %v848_v28  ;;  %v655_v29 = vor.u32 %v680_v24, %v652_v25  ;;  %v642_v30 = vld [vmem:[%s937_s25 + $0x10] sm:$0xf]  ;;  %v679_v31 = vld [vmem:[%s937_s25 + $0x14] sm:$0xf0]  ;;  %v397_v45 = vand.u32 127, %v396_v44 }
  0xb8   : > { %382 = vmatpush.bf16.msra.mxu1 %v663_v23  ;;  %404 = vperm.xlu0 %749, %v395_v26   ;;  %v678_v32 = vld [vmem:[%s937_s25 + $0x14] sm:$0xf]  ;;  %v644_v33 = vld [vmem:[%s937_s25 + $0x18] sm:$0xf0]  ;;  %vm408_vm6 = vcmp.ge.s32.totalorder %v395_v26, 0  ;;  %v643_v34 = vor.u32 %v679_v31, %v642_v30  ;;  %s668_s30 = sshll.u32 %s833_s18, 8 }
  0xb9   : > { %750 = vset.pattern.permute.xlu2 %v848_v28  ;;  %v647_v35 = vor.u32 %v678_v32, %v644_v33  ;;  %v634_v36 = vld [vmem:[%s937_s25] sm:$0xf]  ;;  %v677_v37 = vld [vmem:[%s937_s25 + $0x4] sm:$0xf0]  ;;  %v676_v38 = vld [vmem:[%s937_s25 + $0x4] sm:$0xf]  ;;  %v400_v47 = vstv %s668_s30 }
  0xba   : > { %v636_v39 = vld [vmem:[%s937_s25 + $0x8] sm:$0xf0]  ;;  %v409_v40 = vsel %vm408_vm6, 1, %v848_v28  ;;  %v635_v41 = vor.u32 %v677_v37, %v634_v36  ;;  %v312_v43 = vld [vmem:[#allocation2] sm:$0xf]  ;;  %v398_v46 = vadd.s32 128, %v397_v45  ;;  %v401_v49 = vadd.s32 %v400_v47, %v397_v45 }
  0xbb   : > { %370 = vmatpush.bf16.msra.mxu0 %v651_v27  ;;  %v639_v42 = vor.u32 %v676_v38, %v636_v39  ;;  %v849_v54 = vmov 0.0   ;;  %v420_v16 = vld [vmem:[%s1013_s1] sm:$0xff]  ;;  %s850_s7 = smov 127   ;;  %vm486_vm15 = vcmask 7168   ;;  %p671_p0 = scmp.ne.s32.totalorder %s833_s18, 1 }
  0xbc   : > { %383 = vmatpush.bf16.msra.mxu1 %v655_v29  ;;  %v402_v50 = vadd.s32 %v400_v47, %v398_v46  ;;  %v461_v29 = vld [vmem:[#allocation3] sm:$0xff]  ;;  %v466_v47 = vld [vmem:[#allocation4] sm:$0xff] }
  0xbf   : > { %371 = vmatpush.bf16.msra.mxu0 %v643_v34 }
  0xc0   : > { %384 = vmatpush.bf16.msra.mxu1 %v647_v35  ;;  %411 = vperm.xlu0 %749, %v409_v40  }
  0xc3   : > { %372 = vmatpush.bf16.msra.mxu0 %v635_v41  ;;  %v489_v41 = vld [vmem:[#allocation5] sm:$0xff] }
  0xc4   : > { %385 = vmatpush.bf16.msra.mxu1 %v639_v42 }
  0xc6   : > { %664 = vmatmul.msk.bf16.vlgmr.msra.gmra.mxu0 %vm361_vm7, %v312_v43 }
  0xc7   : > { %665 = vmatmul.msk.bf16.vlgmr.msra.gmra.mxu1 %vm361_vm7, %v312_v43 }
 0x12a   : > { %v405_v48 = vpop.permute.xlu0 %404 }
 0x12b   : > { %vm406_vm8 = vcmp.eq.s32.totalorder %v401_v49, %v405_v48  ;;  %vm407_vm9 = vcmp.eq.s32.totalorder %v402_v50, %v405_v48 }
 0x132   : > { %v412_v51 = vpop.permute.xlu0 %411 }
 0x133   : > { %vm413_vm10 = vcmp.eq.s32.totalorder %v412_v51, 1 }
 0x134   : > { %vm967_vm11 = vmand %vm406_vm8, %vm413_vm10 }
 0x135   : > { %vm971_vm12 = vmand %vm407_vm9, %vm413_vm10  ;;  %v669_v55 = vsel %vm967_vm11, 1.0, %v849_v54 }
 0x136   : > { %v670_v56 = vsel %vm971_vm12, 1.0, %v849_v54 }
 0x137   : > { %v426_v57 = vadd.f32 %v670_v56, %v669_v55 }
 0x143   : > { %v374_v58 = vpop.f32.mrf.mxu0 }
 0x144   : > { %v666_v59 = vclamps-f32 %v374_v58, 1.0  ;;  %v387_v60 = vpop.f32.mrf.mxu1 }
 0x145   : > { %v667_v61 = vclamps-f32 %v387_v60, 1.0 }
 0x146   : > { %v421_v62 = vmul.f32 %v669_v55, %v666_v59  ;;  %v452_v23 = vmul.f32 64.0, %v666_v59 }
 0x147   : > { %v422_v63 = vmul.f32 %v670_v56, %v667_v61  ;;  %v453_v24 = vmul.f32 64.0, %v667_v61 }
 0x149   : > { %v423_v0 = vadd.f32 %v422_v63, %v421_v62 }
 0x14b   : > { %424 = vadd.xlane.f32.xlu1 %v423_v0  ;;  %v376_v1 = vpop.f32.mrf.mxu0 }
 0x14c   : > { %v389_v2 = vpop.f32.mrf.mxu1 }
 0x1be   : > { %v425_v3 = vpop.xlane.xlu1 %424 }
 0x1bf   : > { %v429_v4 = vmul.f32 %v425_v3, %v425_v3  ;;  %v444_v19 = vmul.f32 %v425_v3, %v420_v16 }
 0x1c1   : > { %v430_v5 = vsub.f32 1.0, %v429_v4 }
 0x1c3   : > { %v431_v6 = vmax.f32 %v430_v5, 0.0 }
 0x1c5   : > { %751 = vrsqrt.f32 %v431_v6  ;;  %vm439_vm13 = vcmp.eq.f32.partialorder %v431_v6, inf  ;;  %v442_v14 = vand.u32 2147483648, %v431_v6  ;;  %vm441_vm14 = vcmp.eq.f32.partialorder %v431_v6, 0.0 }
 0x1cb   : > { %v752_v7 = vpop.eup %751 }
 0x1cc   : > { %v433_v8 = vmul.f32 %v752_v7, %v431_v6 }
 0x1ce   : > { %v434_v9 = vmul.f32 %v752_v7, %v433_v8 }
 0x1d0   : > { %v435_v10 = vmul.f32 0.5, %v434_v9 }
 0x1d2   : > { %v436_v11 = vsub.f32 1.5, %v435_v10 }
 0x1d4   : > { %v437_v12 = vmul.f32 %v752_v7, %v436_v11 }
 0x1d6   : > { %v438_v13 = vmul.f32 %v437_v12, %v431_v6 }
 0x1d8   : > { %v440_v15 = vsel %vm439_vm13, %v431_v6, %v438_v13 }
 0x1d9   : > { %v443_v17 = vsel %vm441_vm14, %v442_v14, %v440_v15 }
 0x1da   : > { %v445_v18 = vmul.f32 %v443_v17, %v420_v16 }
 0x1dc   : > { %447 = vrot.lane.b32.xlu1 %v445_v18, %s850_s7 }
 0x24e   : > { %v448_v20 = vpop.permute.xlu1 %447 }
 0x24f   : > { %v450_v21 = vsub.f32 %v444_v19, %v448_v20 }
 0x251   : > { %v451_v22 = vmul.f32 64.0, %v450_v21 }
 0x253   : > { %456 = vperm.xlu2 %750, %v451_v22  }
 0x2ad   : > { %v457_v25 = vpop.permute.xlu2 %456 }
 0x2ae   : > { %v459_v26 = vsel %vm967_vm11, %v457_v25, %v452_v23  ;;  %v460_v27 = vsel %vm971_vm12, %v457_v25, %v453_v24 }
 0x2af   : > { %v462_v28 = vmax.f32 %v459_v26, %v460_v27 }
 0x2b1   : > { %463 = vmax.xlane.f32.xlu2 %v462_v28 }
 0x324   : > { %v464_v30 = vpop.xlane.xlu2 %463 }
 0x325   : > { %v465_v31 = vmax.f32 %v461_v29, %v464_v30 }
 0x327   : > { %v467_v32 = vsub.f32 %v461_v29, %v465_v31  ;;  %488 = vst.msk [vmem:[#allocation3] sm:$0xff] %vm486_vm15, %v465_v31  ;;  %473 = vperm.xlu0 %749, %v465_v31  }
 0x329   : > { %v468_v45 = vmul.f32 1.442695, %v467_v32 }
 0x351   : > { %427 = vadd.xlane.f32.xlu0 %v426_v57 }
 0x399   : > { %v474_v33 = vpop.permute.xlu0 %473 }
 0x39a   : > { %v476_v34 = vsub.f32 %v459_v26, %v474_v33  ;;  %v477_v35 = vsub.f32 %v460_v27, %v474_v33 }
 0x39c   : > { %v478_v36 = vmul.f32 1.442695, %v476_v34  ;;  %v480_v37 = vmul.f32 1.442695, %v477_v35 }
 0x39e   : > { %753 = vpow2.f32 %v478_v36 }
 0x39f   : > { %755 = vpow2.f32 %v480_v37 }
 0x3a0   : > { %757 = vpow2.f32 %v468_v45 }
 0x3a4   : > { %v754_v38 = vpop.eup %753 }
 0x3a5   : > { %v756_v39 = vpop.eup %755 }
 0x3a6   : > { %v482_v40 = vadd.f32 %v756_v39, %v754_v38  ;;  %v758_v46 = vpop.eup %757 }
 0x3a7   : > { %v470_v48 = vmul.f32 %v758_v46, %v466_v47 }
 0x3a8   : > { %483 = vadd.xlane.f32.xlu1 %v482_v40 }
 0x3c4   : > { %v428_v42 = vpop.xlane.xlu0 %427 }
 0x3c5   : > { %v490_v43 = vmul.f32 %v451_v22, %v428_v42 }
 0x3c7   : > { %v491_v44 = vadd.f32 %v490_v43, %v489_v41 }
 0x3c9   : > { %492 = vst.msk [vmem:[#allocation5] sm:$0xff] %vm486_vm15, %v491_v44 }
 0x41a   : > { %496 = sbr.rel (%p671_p0) target bundleno = 1076 (0x434), region = 48 }
 0x41b   : > { %v484_v49 = vpop.xlane.xlu1 %483 }
 0x41c   : > { %v485_v50 = vadd.f32 %v484_v49, %v470_v48 }
 0x41e   : > { %487 = vst.msk [vmem:[#allocation4] sm:$0xff] %vm486_vm15, %v485_v50 }
 0x41f   : > { %v497_v53 = vld [vmem:[#allocation3] sm:$0xff]  ;;  %v502_v55 = vld [vmem:[#allocation5] sm:$0xff] }
 0x425   : > { %v498_v51 = vld [vmem:[#allocation4] sm:$0xff] }
 0x426   : > { %759 = vlog2.f32 %v498_v51 }
 0x42c   : > { %v760_v52 = vpop.eup %759 }
 0x42d   : > { %v500_v54 = vmul.f32 0.6931472, %v760_v52 }
 0x42f   : > { %v501_v56 = vadd.f32 %v500_v54, %v497_v53 }
 0x431   : > { %v503_v57 = vsub.f32 %v501_v56, %v502_v55 }
 0x433   : > { %504 = vst.msk [vmem:[%s1016_s4] sm:$0xff] %vm486_vm15, %v503_v57 }
 0x434 PF: > { %s17_s20 = sadd.s32 1, %s841_s20   ;;  %s1023_s15 = smov %s825_s16 }
 0x435   : > { %p14_p1 = scmp.ge.s32.totalorder %s17_s20, 4   ;;  %s1024_s16 = smov %s829_s17 }
 0x436   : > { %s1025_s17 = smov %s925_s27  ;;  %s1026_s18 = smov %s837_s19 }
 0x437   : > { %s1027_s19 = smov %s1029_s22  ;;  %16 = sbr.rel (!%p14_p1) target bundleno = 4 (0x4), region = 93 }
 0x43c   :  { %524 = vsyncpa [#allocation7], 1 }
 0x43d   :  { %526 = vsyncpa [#allocation7 + $0x1], 1 }

</bundles_post_ra>
